<compile_context>
chip_gen: v7x
topology: tpu7x:2x2x1
jax: 0.10.0
libtpu: 0.0.40
codegen_flags: <defaults>
</compile_context>

<pallas_src>
import functools
import math

import jax
import jax.numpy as jnp
from jax.experimental import pallas as pl
from jax.experimental.pallas import tpu as pltpu


def _round_up(n, m):
    return ((n + m - 1) // m) * m


def _from_rgb_kernel(x_ref, w_ref, b_ref, o_ref, *, neg_slope):
    # x_ref: (C_in, T)  w_ref: (C_out, C_in)  b_ref: (C_out, 1)  o_ref: (C_out, T)
    # 1x1 conv == channel matmul; accumulate in f32 on the MXU.
    y = jnp.dot(w_ref[...], x_ref[...], preferred_element_type=jnp.float32)
    y = y + b_ref[...]                                    # broadcast over lanes
    # LeakyReLU(a), 0 < a < 1  ==  max(y, a*y): single max instead of cmp+sel.
    o_ref[...] = jnp.maximum(y, neg_slope * y).astype(o_ref.dtype)


def _pick_spatial_tile(hw_pad, batch, c_in, c_out, itemsize, t_cap, vmem_budget):
    """Largest multiple-of-128 tile that divides hw_pad, fits the VMEM budget,
    stays <= t_cap, and (when batch == 1) leaves >= 2 parallel grid steps."""
    m = hw_pad // 128
    # Double-buffered input + output tiles; weight/bias blocks are negligible.
    bytes_per_col = 2 * itemsize * (c_in + c_out)
    d_budget = max(1, vmem_budget // (bytes_per_col * 128))
    d_max = min(m, max(1, t_cap // 128), d_budget)
    if batch == 1 and m >= 2:
        d_max = min(d_max, m // 2)    # keep >= 2 parallel steps (v7x megacore)
    d_max = max(1, d_max)
    for d in range(d_max, 0, -1):
        if m % d == 0:
            return d * 128
    return 128


def from_rgb(x_nchw, weight, bias, *, neg_slope=0.2, t_spatial=8192,
             vmem_budget_bytes=20 * 1024 * 1024):
    """FromRGB forward: EqualizedConv2d(in, out, k=1) + LeakyReLU(0.2).

    x_nchw: (B, C_in, H, W); weight: (C_out, C_in) or (C_out, C_in, 1, 1);
    bias: (C_out,). Returns (B, C_out, H, W) in the input dtype.
    """
    B, C_in, H, W = x_nchw.shape
    weight = weight.reshape(weight.shape[0], -1)          # (C_out, C_in)
    C_out = weight.shape[0]
    assert weight.shape[1] == C_in

    fan_in = C_in * 1 * 1                                 # kernel_size = 1
    scale = math.sqrt(2.0 / fan_in)                       # equalized LR scale

    HW = H * W
    # Channel-major view: (B, C_in, H*W). Pure reshape -> no transpose passes.
    x_mat = x_nchw.reshape(B, C_in, HW)

    # Pad only to a lane multiple (128), never to T. For the usual power-of-two
    # spatial sizes this is a no-op, so no extra HBM copy pass is emitted.
    HW_pad = _round_up(HW, 128)
    if HW_pad != HW:
        x_mat = jnp.pad(x_mat, ((0, 0), (0, 0), (0, HW_pad - HW)))

    itemsize = jnp.dtype(x_mat.dtype).itemsize
    T = _pick_spatial_tile(HW_pad, B, C_in, C_out, itemsize,
                           t_cap=t_spatial, vmem_budget=vmem_budget_bytes)
    n_tiles = HW_pad // T

    # Fold the equalized-LR scale into the (grid-resident) weight once, in f32.
    w_mat = (weight.astype(jnp.float32) * scale).astype(x_mat.dtype)
    b_mat = bias.reshape(C_out, 1).astype(jnp.float32)    # (C_out, 1)

    kernel = functools.partial(_from_rgb_kernel, neg_slope=neg_slope)

    cost = pl.CostEstimate(
        flops=2 * B * C_out * C_in * HW_pad,
        transcendentals=0,
        bytes_accessed=itemsize * B * HW_pad * (C_in + C_out)
        + int(w_mat.size) * itemsize + int(b_mat.size) * 4,
    )

    out_mat = pl.pallas_call(
        kernel,
        out_shape=jax.ShapeDtypeStruct((B, C_out, HW_pad), x_mat.dtype),
        grid_spec=pltpu.PrefetchScalarGridSpec(
            num_scalar_prefetch=0,
            grid=(B, n_tiles),
            in_specs=[
                pl.BlockSpec((None, C_in, T), lambda b, s: (b, 0, s)),
                pl.BlockSpec((C_out, C_in), lambda b, s: (0, 0)),
                pl.BlockSpec((C_out, 1), lambda b, s: (0, 0)),
            ],
            out_specs=pl.BlockSpec((None, C_out, T), lambda b, s: (b, 0, s)),
        ),
        compiler_params=pltpu.CompilerParams(
            dimension_semantics=("parallel", "parallel"),
            vmem_limit_bytes=32 * 1024 * 1024,
        ),
        cost_estimate=cost,
    )(x_mat, w_mat, b_mat)

    if HW_pad != HW:
        out_mat = out_mat[:, :, :HW]
    # Free reshape back to NCHW.
    return out_mat.reshape(B, C_out, H, W)


if __name__ == "__main__":
    key = jax.random.PRNGKey(0)
    kx, kw, kb = jax.random.split(key, 3)

    B, C_in, H, W = 2, 3, 16, 16
    C_out = 32

    x = jax.random.normal(kx, (B, C_in, H, W), dtype=jnp.float32)
    # EqualizedConv2d init: weight ~ N(0, 1) (scale applied at runtime).
    weight = jax.random.normal(kw, (C_out, C_in), dtype=jnp.float32)
    bias = 0.1 * jax.random.normal(kb, (C_out,), dtype=jnp.float32)

    out = from_rgb(x, weight, bias)
    out = jax.block_until_ready(out)

    # Plain-JAX reference (1x1 conv == channel matmul), same semantics.
    scale = math.sqrt(2.0 / C_in)
    ref = jnp.einsum("bchw,oc->bohw", x, weight * scale) + bias[None, :, None, None]
    ref = jnp.where(ref > 0, ref, 0.2 * ref)

    assert out.shape == (B, C_out, H, W)
    assert jnp.allclose(out, ref, atol=1e-5, rtol=1e-5)

    print("KERNEL_OK")
</pallas_src>

<mosaic_0001>
module attributes {stable_mosaic.version = 11 : i64} {
  func.func @_from_rgb_kernel(%arg0: i32, %arg1: i32, %arg2: memref<1x3x256xf32, #tpu.memory_space<vmem>>, %arg3: memref<32x3xf32, #tpu.memory_space<vmem>>, %arg4: memref<32x1xf32, #tpu.memory_space<vmem>>, %arg5: memref<1x32x256xf32, #tpu.memory_space<vmem>>) attributes {dimension_semantics = [#tpu.dimension_semantics<parallel>, #tpu.dimension_semantics<parallel>], iteration_bounds = array<i64: 2, 1>, scalar_prefetch = 0 : i64, scratch_operands = 0 : i64, tpu.core_type = #tpu.core_type<tc>, window_params = [{transform_indices = @transform_0, window_bounds = array<i64: 1, 3, 256>}, {pipeline_mode = #tpu.pipeline_mode<synchronous>, transform_indices = @transform_1, window_bounds = array<i64: 32, 3>}, {pipeline_mode = #tpu.pipeline_mode<synchronous>, transform_indices = @transform_2, window_bounds = array<i64: 32, 1>}, {transform_indices = @transform_3, window_bounds = array<i64: 1, 32, 256>}]} {
    %c0 = arith.constant 0 : index
    %c0_0 = arith.constant 0 : index
    %0 = vector.load %arg3[%c0, %c0_0] : memref<32x3xf32, #tpu.memory_space<vmem>>, vector<32x3xf32>
    %c0_1 = arith.constant 0 : index
    %c0_2 = arith.constant 0 : index
    %c0_3 = arith.constant 0 : index
    %1 = vector.load %arg2[%c0_1, %c0_2, %c0_3] : memref<1x3x256xf32, #tpu.memory_space<vmem>>, vector<1x3x256xf32>
    %2 = vector.shape_cast %1 : vector<1x3x256xf32> to vector<3x256xf32>
    %cst = arith.constant dense<0.000000e+00> : vector<32x256xf32>
    %3 = tpu.matmul %0, %2, %cst {dimension_numbers = #tpu.dot_dimension_numbers<[1], [0], [0], [1], [0, 0, 1, 1], [], []>} : vector<32x3xf32>, vector<3x256xf32>, vector<32x256xf32> -> vector<32x256xf32>
    %c0_4 = arith.constant 0 : index
    %c0_5 = arith.constant 0 : index
    %4 = vector.load %arg4[%c0_4, %c0_5] : memref<32x1xf32, #tpu.memory_space<vmem>>, vector<32x1xf32>
    %5 = vector.broadcast %4 : vector<32x1xf32> to vector<32x256xf32>
    %6 = arith.addf %3, %5 : vector<32x256xf32>
    %cst_6 = arith.constant 2.000000e-01 : f32
    %7 = vector.broadcast %cst_6 : f32 to vector<32x256xf32>
    %8 = arith.mulf %7, %6 : vector<32x256xf32>
    %9 = arith.maximumf %6, %8 : vector<32x256xf32>
    %c0_7 = arith.constant 0 : index
    %c0_8 = arith.constant 0 : index
    %c0_9 = arith.constant 0 : index
    %10 = vector.load %arg5[%c0_7, %c0_8, %c0_9] : memref<1x32x256xf32, #tpu.memory_space<vmem>>, vector<1x32x256xf32>
    %11 = vector.shape_cast %10 : vector<1x32x256xf32> to vector<32x256xf32>
    %12 = vector.shape_cast %9 : vector<32x256xf32> to vector<1x32x256xf32>
    tpu.vector_store %arg5[%c0_7, %c0_8, %c0_9], %12 {strides = array<i32>} : memref<1x32x256xf32, #tpu.memory_space<vmem>>, vector<1x32x256xf32>,
    return
  }
  func.func @transform_0(%arg0: i32, %arg1: i32) -> (i32, i32, i32) {
    %c0_i32 = arith.constant 0 : i32
    %c0_i32_0 = arith.constant 0 : i32
    return %arg0, %c0_i32, %arg1 : i32, i32, i32
  }
  func.func @transform_1(%arg0: i32, %arg1: i32) -> (i32, i32) {
    %c0_i32 = arith.constant 0 : i32
    %c0_i32_0 = arith.constant 0 : i32
    %c0_i32_1 = arith.constant 0 : i32
    return %c0_i32, %c0_i32_0 : i32, i32
  }
  func.func @transform_2(%arg0: i32, %arg1: i32) -> (i32, i32) {
    %c0_i32 = arith.constant 0 : i32
    %c0_i32_0 = arith.constant 0 : i32
    %c0_i32_1 = arith.constant 0 : i32
    return %c0_i32, %c0_i32_0 : i32, i32
  }
  func.func @transform_3(%arg0: i32, %arg1: i32) -> (i32, i32, i32) {
    %c0_i32 = arith.constant 0 : i32
    %c0_i32_0 = arith.constant 0 : i32
    return %arg0, %c0_i32, %arg1 : i32, i32, i32
  }
}

</mosaic_0001>

<bundles_post_ra>
// kernel: tpu_custom_call.1
= control target key start
LH: loop header
LB: loop body
LE: loop exit
PB: predicated region body
PF: predicated region fallthrough
CT: control target
= control target key end

     0   :  { %8 = vsyncpa [#allocation3], 0  ;;  %s790_s0 = inlined_call_operand.vmem [shape: f32[2,3,256], index: 0, kind: input, shape index: {}]   ;;  %s791_s1 = inlined_call_operand.vmem [shape: f32[32,3], index: 1, kind: input, shape index: {}]   ;;  %s792_s2 = inlined_call_operand.vmem [shape: f32[32,1], index: 2, kind: input, shape index: {}]   ;;  %s793_s3 = inlined_call_operand.hbm [shape: f32[2,32,256], index: 3, kind: output, shape index: {}]  }
   0x1   :  { %10 = vsyncpa [#allocation3 + $0x1], 0  ;;  %s647_s12 = smov 0   ;;  %s649_s13 = smov 0  }
   0x2   :  { %s651_s14 = smov 0   ;;  %s653_s15 = smov 0  }
   0x3   :  { %s655_s16 = smov 0   ;;  %s657_s17 = smov 0  }
   0x4 LB: > { %s457_s18 = sadd.s32 4294967295, %s620_s17   ;;  %s458_s19 = sadd.s32 4294967294, %s620_s17   ;;  %s620_s17 = sphi %s657_s17, %s16_s17   ;;  %s616_s16 = sphi %s655_s16, %s800_s16   ;;  %s612_s15 = sphi %s653_s15, %s799_s15   ;;  %s608_s14 = sphi %s651_s14, %s798_s14   ;;  %s604_s13 = sphi %s649_s13, %s797_s13   ;;  %s600_s12 = sphi %s647_s12, %s796_s12  }
   0x5   : > { %s28_s20 = sadd.s32 1, %s616_s16  ;;  %s107_s21 = sadd.s32 1, %s608_s14 }
   0x6   : > { %p30_p0 = scmp.ge.s32.totalorder %s28_s20, 2  ;;  %p117_p1 = scmp.ne.s32.totalorder %s608_s14, %s604_s13 }
   0x7   : > { %p118_p2 = scmp.eq.s32.totalorder %s457_s18, 1  ;;  %p123_p3 = scmp.ne.s32.totalorder %s604_s13, %s600_s12 }
   0x8   : > { %s802_s20 = smov (%p30_p0, %s28_s20), 0  ;;  %p124_p5 = scmp.eq.s32.totalorder %s458_s19, 1 }
   0x9   : > { %p687_p4 = por %p118_p2, %p117_p1  ;;  %s102_s23 = ssub.s32 %s616_s16, %s802_s20 }
   0xa   : > { %p461_p6 = scmp.ge.s32.totalorder %s620_s17, 1  ;;  %p105_p7 = scmp.eq.s32.totalorder %s102_s23, 0 }
   0xb   : > { %p694_p8 = por %p124_p5, %p123_p3  ;;  %p161_p9 = scmp.lt.s32.totalorder %s620_s17, 3 }
   0xc   : > { %s700_s25 = scalar_select %p105_p7, %s608_s14, %s107_s21  }
   0xd   : > { %p162_p10 = pnand %p461_p6, %p161_p9 }
   0xe   : > { %p190_p11 = scmp.lt.s32.totalorder (!%p162_p10), %s612_s15, 1  ;;  %v622_v0 = vmov (!%p162_p10), 0.0   ;;  %v207_v1 = vld [vmem:[%s792_s2 + $0x10] sm:$0xff] (!%p162_p10)  ;;  %v623_v2 = vmov (!%p162_p10), 0   ;;  %v205_v3 = vld [vmem:[%s792_s2] sm:$0xff] (!%p162_p10)  ;;  %v208_v4 = vld [vmem:[%s792_s2 + $0x18] sm:$0xff] (!%p162_p10) }
   0xf   : > { %165 = sbr.rel (%p162_p10) target bundleno = 269 (0x10d), region = 32  ;;  %313 = vmatprep.mubr.f32.mxu0 (!%p162_p10), %v622_v0  ;;  %325 = vmatprep.mubr.f32.mxu1 (!%p162_p10), %v622_v0  ;;  %v206_v5 = vld [vmem:[%s792_s2 + $0x8] sm:$0xff] (!%p162_p10)  ;;  %vm244_vm0 = vcmask (!%p162_p10), 1042432   ;;  %v200_v8 = vld [vmem:[%s791_s1] sm:$0xff] (!%p162_p10)  ;;  %vm231_vm1 = vcmask (!%p162_p10), 23552   ;;  %v202_v9 = vld [vmem:[%s791_s1 + $0x10] sm:$0xff] (!%p162_p10) }
  0x10   : > { %540 = vset.pattern.permute.xlu1 (!%p162_p10), %v623_v2  ;;  %539 = vset.pattern.permute.xlu0 (!%p162_p10), %v623_v2  ;;  %v201_v10 = vld [vmem:[%s791_s1 + $0x8] sm:$0xff] (!%p162_p10)  ;;  %v203_v11 = vld [vmem:[%s791_s1 + $0x18] sm:$0xff] (!%p162_p10)  ;;  %s186_s30 = sand.u32 (!%p162_p10), 1, %s604_s13   ;;  %s477_s5 = sshll.u32 (!%p162_p10), %s612_s15, 10 }
  0x11   : > { %221 = vperm.xlu1 (!%p162_p10), %540, %v207_v1   ;;  %211 = vperm.xlu0 (!%p162_p10), %539, %v205_v3   ;;  %s738_s10 = scalar_lea.hbm (!%p162_p10), %s793_s3, %s477_s5  ;;  %s624_s18 = smov (!%p162_p10), [#allocation2]  }
  0x12   : > { %s546_s19 = sshll.u32 (!%p162_p10), %s624_s18, 4  ;;  %s547_s19 = int_to_ptr.vmem [resolvable:$false] %s546_s19 }
  0x13   : > { %s548_s21 = scalar_lea.vmem (!%p162_p10), %s547_s19, 2048 }
  0x15   : > { %226 = vperm.xlu1 (!%p162_p10), %540, %v208_v4   ;;  %216 = vperm.xlu0 (!%p162_p10), %539, %v206_v5  }
  0x16   : > { %s191_s28 = scalar_select %p190_p11, %s612_s15, 1 }
  0x17   : > { %s744_s15 = scalar_lea.sflag [#allocation3], %s186_s30 }
  0x18   : > { %s476_s4 = sshll.u32 %s191_s28, 3 }
  0x19   : > { %s197_s11 = scalar_lea.vmem %s790_s0, %s476_s4  ;;  %s462_s4 = sshll.u32 %s186_s30, 6 }
  0x1a   : > { %v204_v6 = vld [vmem:[%s197_s11] sm:$0x77]  ;;  %s188_s6 = scalar_lea.vmem [#allocation2], %s462_s4 }
  0x1b   : > { %v230_v7 = vcombine.high %v204_v6, %v204_v6  ;;  %s378_s7 = sshll.u32 %s188_s6, 4  ;;  %s740_s7 = int_to_ptr.vmem [resolvable:$true] %s378_s7 }
  0x1c   : > { %s542_s11 = scalar_lea.vmem %s740_s7, 1024  ;;  %p549_p1 = scmp.lt.s32.totalorder %s740_s7, %s547_s19 }
  0x1d   : > { %465 = vmatprep.subr.msk.mxu0 %vm244_vm0, %v230_v7  ;;  %478 = vmatprep.subr.msk.mxu1 %vm244_vm0, %v230_v7  ;;  %p543_p12 = scmp.ne.s32.totalorder %s740_s7, %s542_s11  ;;  %p550_p2 = scmp.lt.s32.totalorder %s548_s21, %s542_s11 }
  0x1e   : > { %466 = vmatpush1.msk.msra.mxu0 %vm244_vm0, %v204_v6  ;;  %479 = vmatpush1.msk.msra.mxu1 %vm244_vm0, %v204_v6 }
  0x1f   : > { %467 = vmatmul.mubr.msk.f32.vlgmr.msra.gmra.mrb[0].mxu0 %vm231_vm1, %v200_v8  ;;  %469 = vmatmul.mubr.msk.f32.vlgmr.msra.gmra.mrb[0].mxu1 %vm231_vm1, %v202_v9  ;;  %p544_p13 = pnand %p543_p12, %p687_p4  ;;  %p551_p3 = por %p550_p2, %p549_p1 }
  0x20   : > { %319 = vmatprep.mubr.f32.mxu0 %v622_v0  ;;  %331 = vmatprep.mubr.f32.mxu1 %v622_v0 }
  0x21   : > { %p545_p0 = pneg %p544_p13 }
  0x23   : > { %468 = vmatmul.mubr.msk.f32.gmra.mrb[2].mxu0 %vm231_vm1, %v201_v10  ;;  %470 = vmatmul.mubr.msk.f32.gmra.mrb[2].mxu1 %vm231_vm1, %v203_v11  ;;  %p552_p5 = pnand %p551_p3, %p545_p0 }
  0x90   : > { %v222_v12 = vpop.permute.xlu1 %221  ;;  %v212_v13 = vpop.permute.xlu0 %211 }
  0x94   : > { %v227_v24 = vpop.permute.xlu1 %226  ;;  %v217_v25 = vpop.permute.xlu0 %216 }
  0xf2   : > { %v315_v14 = vpop.f32.mrb[0].mxu0  ;;  %v327_v15 = vpop.f32.mrb[0].mxu1 }
  0xf3   : > { %v316_v16 = vadd.f32 %v315_v14, %v212_v13  ;;  %v328_v17 = vadd.f32 %v327_v15, %v222_v12  ;;  %v317_v18 = vpop.f32.mrb[1].mxu0  ;;  %v329_v19 = vpop.f32.mrb[1].mxu1 }
  0xf4   : > { %v318_v20 = vadd.f32 %v317_v18, %v212_v13  ;;  %v330_v21 = vadd.f32 %v329_v19, %v222_v12 }
  0xf5   : > { %v338_v22 = vmul.f32 0.2, %v316_v16  ;;  %v342_v23 = vmul.f32 0.2, %v328_v17 }
  0xf6   : > { %v339_v26 = vmul.f32 0.2, %v318_v20  ;;  %v343_v27 = vmul.f32 0.2, %v330_v21  ;;  %v321_v28 = vpop.f32.mrb[2].mxu0  ;;  %v333_v29 = vpop.f32.mrb[2].mxu1 }
  0xf7   : > { %v346_v30 = vmax.f32 %v316_v16, %v338_v22  ;;  %v350_v31 = vmax.f32 %v328_v17, %v342_v23  ;;  %v322_v32 = vadd.f32 %v321_v28, %v217_v25  ;;  %v334_v33 = vadd.f32 %v333_v29, %v227_v24  ;;  %v323_v34 = vpop.f32.mrb[3].mxu0  ;;  %v335_v35 = vpop.f32.mrb[3].mxu1 }
  0xf8   : > { %v347_v36 = vmax.f32 %v318_v20, %v339_v26  ;;  %v351_v37 = vmax.f32 %v330_v21, %v343_v27  ;;  %v324_v38 = vadd.f32 %v323_v34, %v217_v25  ;;  %v336_v39 = vadd.f32 %v335_v35, %v227_v24 }
  0xf9   : > { %354 = vst [vmem:[%s188_s6] sm:$0xff] %v346_v30  ;;  %358 = vst [vmem:[%s188_s6 + $0x20] sm:$0xff] %v350_v31  ;;  %v340_v40 = vmul.f32 0.2, %v322_v32  ;;  %v344_v41 = vmul.f32 0.2, %v334_v33 }
  0xfa   : > { %355 = vst [vmem:[%s188_s6 + $0x8] sm:$0xff] %v347_v36  ;;  %359 = vst [vmem:[%s188_s6 + $0x28] sm:$0xff] %v351_v37  ;;  %v341_v42 = vmul.f32 0.2, %v324_v38  ;;  %v345_v43 = vmul.f32 0.2, %v336_v39 }
  0xfb   : > { %v348_v44 = vmax.f32 %v322_v32, %v340_v40  ;;  %v352_v45 = vmax.f32 %v334_v33, %v344_v41 }
  0xfc   : > { %v349_v46 = vmax.f32 %v324_v38, %v341_v42  ;;  %v353_v47 = vmax.f32 %v336_v39, %v345_v43 }
  0xfd   : > { %356 = vst [vmem:[%s188_s6 + $0x10] sm:$0xff] %v348_v44  ;;  %360 = vst [vmem:[%s188_s6 + $0x30] sm:$0xff] %v352_v45 }
  0xfe   : > { %357 = vst [vmem:[%s188_s6 + $0x18] sm:$0xff] %v349_v46  ;;  %361 = vst [vmem:[%s188_s6 + $0x38] sm:$0xff] %v353_v47 }
  0xff   : > { %555 = shalt.err (!%p552_p5)
}
 0x100   : > { %s556_s23 = scalar_lea.hbm %s738_s10, 1024  ;;  %s560_s28 = scalar_lea.hbm %s793_s3, 2048 }
 0x101   : > { %p557_p6 = scmp.ne.s32.totalorder %s738_s10, %s556_s23  ;;  %p561_p10 = scmp.lt.u32.totalorder %s738_s10, %s793_s3 }
 0x102   : > { %p562_p11 = scmp.lt.u32.totalorder %s560_s28, %s556_s23  ;;  %p564_p13 = scmp.lt.u32.totalorder %s556_s23, %s738_s10 }
 0x103   : > { %p558_p7 = pnand %p557_p6, %p687_p4 }
 0x104   : > { %p563_p12 = por %p562_p11, %p561_p10 }
 0x105   : > { %p559_p9 = pneg %p558_p7 }
 0x106   : > { %p565_p0 = por %p564_p13, %p563_p12 }
 0x108   : > { %p566_p1 = pnand %p565_p0, %p559_p9 }
 0x10a   : > { %569 = shalt.err (!%p566_p1)
}
 0x10b   : > { %s625_s4 = smov 256   ;;  %s626_s5 = smov 16  }
 0x10c   : > { %480 = dma.vmem_to_hbm [thread:$0]  (%p687_p4), %s740_s7, 1024, %s738_s10, %s744_s15, %s625_s4, %s625_s4, %s626_s5  }
 0x10d PF: > { %p486_p2 = scmp.ge.s32.totalorder %s620_s17, 2  ;;  %s393_s6 = sand.u32 1, %s600_s12  }
 0x10e   : > { %s394_s8 = scalar_lea.sflag [#allocation3], %s393_s6 }
 0x10f   : > { %p483_p3 = pnand %p486_p2, %p694_p8 }
 0x111   : > { %595 = dma.done.wait (!%p483_p3), %s394_s8, 1024  }
 0x112   : > { %597 = vsyncadd (!%p483_p3), %s394_s8, 4294966272  ;;  %s16_s17 = sadd.s32 1, %s620_s17   ;;  %s796_s12 = smov %s604_s13 }
 0x113   : > { %p13_p5 = scmp.ge.s32.totalorder %s16_s17, 4   ;;  %s797_s13 = smov %s608_s14 }
 0x114   : > { %s798_s14 = smov %s700_s25  ;;  %s799_s15 = smov %s616_s16 }
 0x115   : > { %s800_s16 = smov %s802_s20  ;;  %15 = sbr.rel (!%p13_p5) target bundleno = 4 (0x4), region = 67 }
 0x11c   :  { %399 = vsyncpa [#allocation3], 1 }
 0x11d   :  { %401 = vsyncpa [#allocation3 + $0x1], 1 }

</bundles_post_ra>
